<compile_context>
chip_gen: v7x
topology: tpu7x:2x2x1
jax: 0.10.0
libtpu: 0.0.40
codegen_flags: <defaults>
</compile_context>

<pallas_src>
import jax
import jax.numpy as jnp
from jax.experimental import pallas as pl
from jax.experimental.pallas import tpu as pltpu


def simplenet_kernel(x_ref, w1t_ref, b1_ref, w2r_ref, b2_ref, o_ref):
    # x:   [tb, D]    w1t: [D, H]    b1: [1, H]    w2r: [1, H]    b2 (SMEM): [1]
    # Linear1 on the MXU with f32 accumulation -> hidden [tb, H].
    h = jnp.dot(x_ref[...], w1t_ref[...], preferred_element_type=jnp.float32)
    h = jnp.maximum(h + b1_ref[...], 0.0)                     # bias + ReLU (VPU)
    # Linear2 (K=8, N=1): VPU multiply + lane-axis reduce instead of a tiny matmul.
    out = jnp.sum(h * w2r_ref[...], axis=-1, keepdims=True) + b2_ref[0]
    o_ref[...] = out.astype(o_ref.dtype)                      # [tb, 1]


def _pick_batch_tile(B, D, itemsize, target_bytes=4 << 20):
    """Batch tile: ~4 MiB of x per buffer, >=2 grid steps when the batch allows."""
    tb = max(8, target_bytes // max(1, D * itemsize))
    tb = (tb // 8) * 8
    if B >= 16:
        # Keep at least 2 grid steps so both v7x TensorCores get work.
        half = ((pl.cdiv(B, 2) + 7) // 8) * 8
        tb = min(tb, max(8, half))
    if tb >= B:
        return B        # single full-extent block (valid even when B % 8 != 0)
    return tb


def simplenet_forward(x, w1, b1, w2, b2):
    """x: [B, D] f32.  w1: [8, D], b1: [8], w2: [1, 8], b2: [1]  (PyTorch shapes)."""
    B, D = x.shape
    H = w1.shape[0]          # 8
    O = w2.shape[0]          # 1
    f32 = jnp.float32

    if x.dtype != f32:
        x = x.astype(f32)

    # Tiny parameter plumbing (a few hundred bytes, done once outside the kernel).
    w1_t = w1.astype(f32).T                 # [D, H]
    b1_r = b1.astype(f32).reshape(1, H)     # [1, H]  broadcasts across the tile rows
    w2_r = w2.astype(f32).reshape(1, H)     # [1, H]
    b2_s = b2.astype(f32).reshape(O)        # [1] -> SMEM scalar

    tb = _pick_batch_tile(B, D, 4)
    grid = (pl.cdiv(B, tb),)                # partial last tile handled by Pallas

    cost = pl.CostEstimate(
        flops=2 * B * D * H + 3 * B * H,
        transcendentals=0,
        bytes_accessed=4 * (B * D + B * O + D * H + H + H + O),
    )

    out = pl.pallas_call(
        simplenet_kernel,
        out_shape=jax.ShapeDtypeStruct((B, O), f32),
        grid=grid,
        in_specs=[
            pl.BlockSpec((tb, D), lambda i: (i, 0)),   # x streamed, natural layout
            pl.BlockSpec((D, H), lambda i: (0, 0)),    # w1^T: resident
            pl.BlockSpec((1, H), lambda i: (0, 0)),    # b1 row: resident
            pl.BlockSpec((1, H), lambda i: (0, 0)),    # w2 row: resident
            pl.BlockSpec(memory_space=pltpu.MemorySpace.SMEM),  # b2 scalar
        ],
        out_specs=pl.BlockSpec((tb, O), lambda i: (i, 0)),
        compiler_params=pltpu.CompilerParams(
            dimension_semantics=("parallel",)),
        cost_estimate=cost,
    )(x, w1_t, b1_r, w2_r, b2_s)

    return out   # [B, 1], matching the PyTorch module output


def reference_forward(x, w1, b1, w2, b2):
    h = jnp.maximum(x @ w1.T + b1, 0.0)
    return h @ w2.T + b2


if __name__ == "__main__":
    # Small shapes consistent with the module: tabular batch of 8 rows, input_dim=16.
    B, D, H, O = 8, 16, 8, 1

    key = jax.random.PRNGKey(0)
    kx, k1, k2, k3, k4 = jax.random.split(key, 5)

    x = jax.random.normal(kx, (B, D), dtype=jnp.float32)

    # Deterministic "Kaiming-uniform-ish" init matching PyTorch param shapes.
    bound1 = 1.0 / jnp.sqrt(D)
    w1 = jax.random.uniform(k1, (H, D), minval=-bound1, maxval=bound1, dtype=jnp.float32)
    b1 = jax.random.uniform(k2, (H,), minval=-bound1, maxval=bound1, dtype=jnp.float32)
    bound2 = 1.0 / jnp.sqrt(H)
    w2 = jax.random.uniform(k3, (O, H), minval=-bound2, maxval=bound2, dtype=jnp.float32)
    b2 = jax.random.uniform(k4, (O,), minval=-bound2, maxval=bound2, dtype=jnp.float32)

    out = simplenet_forward(x, w1, b1, w2, b2)
    out = jax.block_until_ready(out)

    ref = reference_forward(x, w1, b1, w2, b2)
    assert out.shape == (B, O)
    assert jnp.allclose(out, ref, atol=1e-5, rtol=1e-5), "mismatch vs reference"

    print("KERNEL_OK")
</pallas_src>

<mosaic_0001>
module attributes {stable_mosaic.version = 11 : i64} {
  func.func @simplenet_kernel(%arg0: i32, %arg1: memref<8x16xf32, #tpu.memory_space<vmem>>, %arg2: memref<16x8xf32, #tpu.memory_space<vmem>>, %arg3: memref<1x8xf32, #tpu.memory_space<vmem>>, %arg4: memref<1x8xf32, #tpu.memory_space<vmem>>, %arg5: memref<1xf32, #tpu.memory_space<smem>>, %arg6: memref<8x1xf32, #tpu.memory_space<vmem>>) attributes {dimension_semantics = [#tpu.dimension_semantics<parallel>], iteration_bounds = array<i64: 1>, scalar_prefetch = 0 : i64, scratch_operands = 0 : i64, tpu.core_type = #tpu.core_type<tc>, window_params = [{transform_indices = @transform_0, window_bounds = array<i64: 8, 16>}, {pipeline_mode = #tpu.pipeline_mode<synchronous>, transform_indices = @transform_1, window_bounds = array<i64: 16, 8>}, {pipeline_mode = #tpu.pipeline_mode<synchronous>, transform_indices = @transform_2, window_bounds = array<i64: 1, 8>}, {pipeline_mode = #tpu.pipeline_mode<synchronous>, transform_indices = @transform_3, window_bounds = array<i64: 1, 8>}, {transform_indices = @transform_4, window_bounds = array<i64: 1>}, {transform_indices = @transform_5, window_bounds = array<i64: 8, 1>}]} {
    %c0 = arith.constant 0 : index
    %c0_0 = arith.constant 0 : index
    %0 = vector.load %arg1[%c0, %c0_0] : memref<8x16xf32, #tpu.memory_space<vmem>>, vector<8x16xf32>
    %c0_1 = arith.constant 0 : index
    %c0_2 = arith.constant 0 : index
    %1 = vector.load %arg2[%c0_1, %c0_2] : memref<16x8xf32, #tpu.memory_space<vmem>>, vector<16x8xf32>
    %cst = arith.constant dense<0.000000e+00> : vector<8x8xf32>
    %2 = tpu.matmul %0, %1, %cst {dimension_numbers = #tpu.dot_dimension_numbers<[1], [0], [0], [1], [0, 0, 1, 1], [], []>} : vector<8x16xf32>, vector<16x8xf32>, vector<8x8xf32> -> vector<8x8xf32>
    %c0_3 = arith.constant 0 : index
    %c0_4 = arith.constant 0 : index
    %3 = vector.load %arg3[%c0_3, %c0_4] : memref<1x8xf32, #tpu.memory_space<vmem>>, vector<1x8xf32>
    %4 = vector.broadcast %3 : vector<1x8xf32> to vector<8x8xf32>
    %5 = arith.addf %2, %4 : vector<8x8xf32>
    %cst_5 = arith.constant 0.000000e+00 : f32
    %6 = vector.broadcast %cst_5 : f32 to vector<8x8xf32>
    %7 = arith.maximumf %5, %6 : vector<8x8xf32>
    %c0_6 = arith.constant 0 : index
    %c0_7 = arith.constant 0 : index
    %8 = vector.load %arg4[%c0_6, %c0_7] : memref<1x8xf32, #tpu.memory_space<vmem>>, vector<1x8xf32>
    %9 = vector.broadcast %8 : vector<1x8xf32> to vector<8x8xf32>
    %10 = arith.mulf %7, %9 : vector<8x8xf32>
    %cst_8 = arith.constant dense<0.000000e+00> : vector<8xf32>
    %11 = vector.multi_reduction <add>, %10, %cst_8 [1] : vector<8x8xf32> to vector<8xf32>
    %12 = vector.shape_cast %11 : vector<8xf32> to vector<8x1xf32>
    %c0_9 = arith.constant 0 : index
    %13 = memref.load %arg5[%c0_9] : memref<1xf32, #tpu.memory_space<smem>>
    %14 = vector.broadcast %13 : f32 to vector<8x1xf32>
    %15 = arith.addf %12, %14 : vector<8x1xf32>
    %c0_10 = arith.constant 0 : index
    %c0_11 = arith.constant 0 : index
    %16 = vector.load %arg6[%c0_10, %c0_11] : memref<8x1xf32, #tpu.memory_space<vmem>>, vector<8x1xf32>
    tpu.vector_store %arg6[%c0_10, %c0_11], %15 {strides = array<i32>} : memref<8x1xf32, #tpu.memory_space<vmem>>, vector<8x1xf32>,
    return
  }
  func.func @transform_0(%arg0: i32) -> (i32, i32) {
    %c0_i32 = arith.constant 0 : i32
    %c0_i32_0 = arith.constant 0 : i32
    return %arg0, %c0_i32 : i32, i32
  }
  func.func @transform_1(%arg0: i32) -> (i32, i32) {
    %c0_i32 = arith.constant 0 : i32
    %c0_i32_0 = arith.constant 0 : i32
    %c0_i32_1 = arith.constant 0 : i32
    return %c0_i32, %c0_i32_0 : i32, i32
  }
  func.func @transform_2(%arg0: i32) -> (i32, i32) {
    %c0_i32 = arith.constant 0 : i32
    %c0_i32_0 = arith.constant 0 : i32
    %c0_i32_1 = arith.constant 0 : i32
    return %c0_i32, %c0_i32_0 : i32, i32
  }
  func.func @transform_3(%arg0: i32) -> (i32, i32) {
    %c0_i32 = arith.constant 0 : i32
    %c0_i32_0 = arith.constant 0 : i32
    %c0_i32_1 = arith.constant 0 : i32
    return %c0_i32, %c0_i32_0 : i32, i32
  }
  func.func @transform_4(%arg0: i32) -> i32 {
    %c0_i32 = arith.constant 0 : i32
    %c0_i32_0 = arith.constant 0 : i32
    return %c0_i32 : i32
  }
  func.func @transform_5(%arg0: i32) -> (i32, i32) {
    %c0_i32 = arith.constant 0 : i32
    %c0_i32_0 = arith.constant 0 : i32
    return %arg0, %c0_i32 : i32, i32
  }
}

</mosaic_0001>

<bundles_post_ra>
// kernel: tpu_custom_call.1
= control target key start
LH: loop header
LB: loop body
LE: loop exit
PB: predicated region body
PF: predicated region fallthrough
CT: control target
= control target key end

     0   :  { %v146_v0 = vmov 0.0|0.0   ;;  %vm147_vm0 = vmmov 0   ;;  %v148_v3 = vmov 0.0   ;;  %vm31_vm1 = vcmask 130048   ;;  %s200_s1 = inlined_call_operand.vmem [shape: f32[16,8], index: 1, kind: input, shape index: {}]   ;;  %s201_s0 = inlined_call_operand.vmem [shape: f32[8,16], index: 0, kind: input, shape index: {}]   ;;  %s202_s2 = inlined_call_operand.vmem [shape: f32[1,8], index: 2, kind: input, shape index: {}]   ;;  %s203_s3 = inlined_call_operand.vmem [shape: f32[1,8], index: 3, kind: input, shape index: {}]   ;;  %s204_s4 = inlined_call_operand.<no memory space> [shape: f32[1], index: 4, kind: input, shape index: {}]   ;;  %s205_s5 = inlined_call_operand.vmem [shape: f32[8,1], index: 5, kind: output, shape index: {}]  }
   0x1   :  { %140 = vmatprep.subr.bf16.mxu0 %v146_v0  ;;  %v22_v1 = vld [vmem:[%s200_s1] sm:$0xff]  ;;  %v23_v2 = vld [vmem:[%s200_s1 + $0x8] sm:$0xff]  ;;  %137 = vmatprep.mubr.msk.f32.mxu0 %vm147_vm0, %v148_v3  ;;  %vm114_vm2 = vcmask 64512   ;;  %v119_v14 = vstv %s204_s4  ;;  %vm121_vm3 = vcmask 7168  }
   0x2   :  { %v141_v4 = vpack.c.bf16 %v23_v2, %v22_v1  ;;  %v21_v5 = vld [vmem:[%s201_s0] sm:$0xff] }
   0x3   :  { %v127_v6 = vld [vmem:[%s202_s2] ss:$0 sm:$0xff] }
   0x4   :  { %142 = vmatpush3.bf16.msra.mxu0 %v141_v4  ;;  %v129_v10 = vld [vmem:[%s203_s3] ss:$0 sm:$0xff] }
   0x7   :  { %138 = vmatmul.mubr.msk.f32.vlgmr.msra.gmra.mrb[0].mxu0 %vm31_vm1, %v21_v5 }
  0xda   :  { %v101_v7 = vpop.f32.mrb[0].mxu0 }
  0xdb   :  { %v102_v8 = vadd.f32 %v127_v6, %v101_v7  ;;  %v139_v9 = vpop.f32.mrb[1].mxu0 }
  0xdd   :  { %v105_v11 = vmax.f32 %v102_v8, 0.0 }
  0xdf   :  { %v113_v12 = vmul.f32 %v129_v10, %v105_v11 }
  0xe1   :  { %v115_v13 = vsel %vm114_vm2, %v113_v12, 0.0 }
  0xe2   :  { %116 = vadd.xlane.f32.xlu0 %v115_v13 }
 0x16f   :  { %v117_v15 = vpop.xlane.xlu0 %116 }
 0x170   :  { %v120_v16 = vadd.f32 %v119_v14, %v117_v15 }
 0x172   :  { %122 = vst.msk [vmem:[%s205_s5] sm:$0xff] %vm121_vm3, %v120_v16 }

</bundles_post_ra>
